<compile_context>
chip_gen: v6e
topology: v6e:2x2x1
jax: 0.10.0
libtpu: 0.0.40
codegen_flags: <defaults>
</compile_context>

<pallas_src>
import math
import functools

import jax
import jax.numpy as jnp
from jax import lax
from jax.experimental import pallas as pl
from jax.experimental.pallas import tpu as pltpu


def _make_kernel(idfcn, cout):
    def kernel(p_ref, w_ref, s_ref, o_ref):
        # p_ref: (K, Lb)          im2col patches for this block (compute_dtype)
        # w_ref: (idfcn*Cout, K)  basis weights (compute_dtype, grid-invariant)
        # s_ref: (idfcn, Lb)      per-lane idw scales (f32)
        # o_ref: (Cout, Lb)       output slab (out_dtype), Lb = nb*OHWp lanes
        #
        # One MXU contraction for the whole block; f32 accumulation.
        conv = jnp.dot(w_ref[...], p_ref[...],
                       preferred_element_type=jnp.float32)   # (idfcn*Cout, Lb)
        # idw-weighted reduce over the basis dim on the VPU, in f32.
        # conv row slices are vreg-aligned (Cout == 8 sublanes).
        s = s_ref[...]                                        # (idfcn, Lb) f32
        acc = s[0:1, :] * conv[0:cout, :]
        for i in range(1, idfcn):                             # idfcn is tiny, unrolled
            acc = acc + s[i:i + 1, :] * conv[i * cout:(i + 1) * cout, :]
        o_ref[...] = acc.astype(o_ref.dtype)

    return kernel


def _im2col(x_pad, kh, kw, oh, ow, sh, sw, dh, dw):
    """(N, Cin, Hp, Wp) -> (N, Cin*KH*KW, OH*OW), K ordered (cin, kh, kw)."""
    n, cin = x_pad.shape[:2]
    taps = []
    for ih in range(kh):
        for iw in range(kw):
            h0, w0 = ih * dh, iw * dw
            taps.append(x_pad[:, :,
                              h0:h0 + (oh - 1) * sh + 1:sh,
                              w0:w0 + (ow - 1) * sw + 1:sw])
    patches = jnp.stack(taps, axis=2)                    # (N, Cin, KH*KW, OH, OW)
    return patches.reshape(n, cin * kh * kw, oh * ow)


@functools.partial(
    jax.jit,
    static_argnames=("padding", "stride", "dilation", "compute_dtype",
                     "out_dtype", "nb"))
def conv_basis2d(x, weight_basis, idw, padding=(1, 1), stride=(1, 1),
                 dilation=(1, 1), compute_dtype=jnp.bfloat16,
                 out_dtype=jnp.float32, nb=None):
    """x: (N, Cin, H, W); weight_basis: (idfcn*Cout, Cin, KH, KW); idw: (N, idfcn).
    Returns (N, Cout, OH, OW) in out_dtype."""
    n, cin, h, w = x.shape
    _, idfcn = idw.shape
    oc_total, cin_w, kh, kw = weight_basis.shape
    assert cin_w == cin, "groups != 1 not supported"
    cout = oc_total // idfcn
    ph, pw = padding
    sh, sw = stride
    dh, dw = dilation
    oh = (h + 2 * ph - dh * (kh - 1) - 1) // sh + 1
    ow = (w + 2 * pw - dw * (kw - 1) - 1) // sw + 1
    k_dim = cin * kh * kw
    ohw = oh * ow
    ohw_p = -(-ohw // 128) * 128          # per-sample lane width, 128-multiple

    # ---- samples per grid block ------------------------------------------
    p_itm = jnp.dtype(compute_dtype).itemsize
    o_itm = jnp.dtype(out_dtype).itemsize
    per_sample_vmem = ohw_p * (k_dim * p_itm + idfcn * 4 + cout * o_itm)
    if nb is None:
        vmem_budget = 12 * 1024 * 1024    # per buffer; x2 double-buffered ~24 MiB
        dma_target = 1 * 1024 * 1024      # >= ~1 MiB patch DMA per grid step
        nb = min(max(1, vmem_budget // per_sample_vmem),
                 max(1, dma_target // (k_dim * ohw_p * p_itm)),
                 max(1, -(-n // 2)))      # keep >= 2 grid steps when N >= 2
    n_pad = -(-n // nb) * nb              # pad batch instead of degrading nb

    # ---- wrapper-side glue (layout plumbing, compiled by XLA) -------------
    if n_pad > n:
        x = jnp.pad(x, ((0, n_pad - n), (0, 0), (0, 0), (0, 0)))
        idw = jnp.pad(idw, ((0, n_pad - n), (0, 0)))
    x_sp = jnp.pad(x, ((0, 0), (0, 0), (ph, ph), (pw, pw)))
    patches = _im2col(x_sp, kh, kw, oh, ow, sh, sw, dh, dw)   # (n_pad, K, OHW)
    if ohw_p > ohw:
        patches = jnp.pad(patches, ((0, 0), (0, 0), (0, ohw_p - ohw)))
    # (K, n_pad*OHWp): contraction on sublanes, samples*spatial lane-dense.
    patches = jnp.transpose(patches, (1, 0, 2)).reshape(k_dim, n_pad * ohw_p)
    patches = patches.astype(compute_dtype)

    # Basis weights as a single (idfcn*Cout, K) operand, cast once.
    w_all = weight_basis.reshape(idfcn * cout, k_dim).astype(compute_dtype)

    # Per-lane idw scales: row i, lanes [s*OHWp:(s+1)*OHWp] hold idw[s, i].
    idw_lane = jnp.broadcast_to(
        idw.astype(jnp.float32).T[:, :, None], (idfcn, n_pad, ohw_p)
    ).reshape(idfcn, n_pad * ohw_p)

    lanes_blk = nb * ohw_p
    kernel = _make_kernel(idfcn, cout)

    out_flat = pl.pallas_call(
        kernel,
        out_shape=jax.ShapeDtypeStruct((cout, n_pad * ohw_p), out_dtype),
        grid=(n_pad // nb,),
        in_specs=[
            pl.BlockSpec((k_dim, lanes_blk), lambda i: (0, i)),        # patches
            pl.BlockSpec((idfcn * cout, k_dim), lambda i: (0, 0)),     # weights
            pl.BlockSpec((idfcn, lanes_blk), lambda i: (0, i)),        # idw scales
        ],
        out_specs=pl.BlockSpec((cout, lanes_blk), lambda i: (0, i)),
        compiler_params=pltpu.CompilerParams(
            dimension_semantics=("parallel",),
            vmem_limit_bytes=32 * 1024 * 1024),
    )(patches, w_all, idw_lane)

    # (Cout, n_pad, OHWp) -> crop padding -> (N, Cout, OH, OW)
    out = out_flat.reshape(cout, n_pad, ohw_p)[:, :n, :ohw]
    return jnp.transpose(out.reshape(cout, n, oh, ow), (1, 0, 2, 3))


def _reference(x, weight_basis, idw, padding=(1, 1), stride=(1, 1),
               dilation=(1, 1)):
    n = x.shape[0]
    oc_total = weight_basis.shape[0]
    idfcn = idw.shape[1]
    cout = oc_total // idfcn
    conv = lax.conv_general_dilated(
        x, weight_basis, window_strides=stride,
        padding=[(padding[0], padding[0]), (padding[1], padding[1])],
        rhs_dilation=dilation,
        dimension_numbers=("NCHW", "OIHW", "NCHW"))
    oh, ow = conv.shape[2], conv.shape[3]
    conv = conv.reshape(n, idfcn, cout, oh, ow)
    return (conv * idw[:, :, None, None, None]).sum(axis=1)


if __name__ == "__main__":
    # Module config: ConvBasis2d(idfcn=3, in_channels=4, out_channels=8,
    #                            kernel_size=3, stride=1, padding=1, bias=False)
    idfcn, cin, cout, ksize, pad = 3, 4, 8, 3, 1
    N, H, W = 2, 16, 16

    key = jax.random.PRNGKey(0)
    kx, kw_, kidw = jax.random.split(key, 3)

    # Deterministic init mirroring reset_parameters: U(-stdv, stdv),
    # stdv = 1/sqrt(in_channels * kh * kw).
    stdv = 1.0 / math.sqrt(cin * ksize * ksize)
    weight_basis = jax.random.uniform(
        kw_, (idfcn * cout, cin, ksize, ksize),
        minval=-stdv, maxval=stdv, dtype=jnp.float32)

    x = jax.random.normal(kx, (N, cin, H, W), dtype=jnp.float32)
    idw = jax.random.normal(kidw, (N, idfcn), dtype=jnp.float32)

    ref = _reference(x, weight_basis, idw, padding=(pad, pad))

    # Exact-semantics validation path: f32 MXU operands, f32 accumulation.
    out_f32 = jax.block_until_ready(
        conv_basis2d(x, weight_basis, idw, padding=(pad, pad),
                     compute_dtype=jnp.float32))
    assert out_f32.shape == (N, cout, H, W), out_f32.shape
    assert jnp.allclose(out_f32, ref, atol=1e-4, rtol=1e-4), \
        float(jnp.max(jnp.abs(out_f32 - ref)))

    # Default bf16-operand path (bf16-native MXU on v5e/v6e/v7x, f32 accum).
    out_bf16 = jax.block_until_ready(
        conv_basis2d(x, weight_basis, idw, padding=(pad, pad)))
    assert out_bf16.shape == (N, cout, H, W), out_bf16.shape
    assert jnp.allclose(out_bf16, ref, atol=5e-2, rtol=5e-2), \
        float(jnp.max(jnp.abs(out_bf16 - ref)))

    print("KERNEL_OK")
</pallas_src>

<mosaic_0001>
module attributes {stable_mosaic.version = 11 : i64} {
  func.func @kernel(%arg0: i32, %arg1: memref<36x256xf32, #tpu.memory_space<vmem>>, %arg2: memref<24x36xf32, #tpu.memory_space<vmem>>, %arg3: memref<3x256xf32, #tpu.memory_space<vmem>>, %arg4: memref<8x256xf32, #tpu.memory_space<vmem>>) attributes {dimension_semantics = [#tpu.dimension_semantics<parallel>], iteration_bounds = array<i64: 2>, scalar_prefetch = 0 : i64, scratch_operands = 0 : i64, tpu.core_type = #tpu.core_type<tc>, window_params = [{transform_indices = @transform_0, window_bounds = array<i64: 36, 256>}, {pipeline_mode = #tpu.pipeline_mode<synchronous>, transform_indices = @transform_1, window_bounds = array<i64: 24, 36>}, {transform_indices = @transform_2, window_bounds = array<i64: 3, 256>}, {transform_indices = @transform_3, window_bounds = array<i64: 8, 256>}]} {
    %c0 = arith.constant 0 : index
    %c0_0 = arith.constant 0 : index
    %0 = vector.load %arg2[%c0, %c0_0] : memref<24x36xf32, #tpu.memory_space<vmem>>, vector<24x36xf32>
    %c0_1 = arith.constant 0 : index
    %c0_2 = arith.constant 0 : index
    %1 = vector.load %arg1[%c0_1, %c0_2] : memref<36x256xf32, #tpu.memory_space<vmem>>, vector<36x256xf32>
    %cst = arith.constant dense<0.000000e+00> : vector<24x256xf32>
    %2 = tpu.matmul %0, %1, %cst {dimension_numbers = #tpu.dot_dimension_numbers<[1], [0], [0], [1], [0, 0, 1, 1], [], []>} : vector<24x36xf32>, vector<36x256xf32>, vector<24x256xf32> -> vector<24x256xf32>
    %c0_3 = arith.constant 0 : index
    %c0_4 = arith.constant 0 : index
    %3 = vector.load %arg3[%c0_3, %c0_4] : memref<3x256xf32, #tpu.memory_space<vmem>>, vector<3x256xf32>
    %4 = vector.extract_strided_slice %3 {offsets = [0, 0], sizes = [1, 256], strides = [1, 1]} : vector<3x256xf32> to vector<1x256xf32>
    %5 = vector.extract_strided_slice %2 {offsets = [0, 0], sizes = [8, 256], strides = [1, 1]} : vector<24x256xf32> to vector<8x256xf32>
    %6 = vector.broadcast %4 : vector<1x256xf32> to vector<8x256xf32>
    %7 = arith.mulf %6, %5 : vector<8x256xf32>
    %8 = vector.extract_strided_slice %3 {offsets = [1, 0], sizes = [1, 256], strides = [1, 1]} : vector<3x256xf32> to vector<1x256xf32>
    %9 = vector.extract_strided_slice %2 {offsets = [8, 0], sizes = [8, 256], strides = [1, 1]} : vector<24x256xf32> to vector<8x256xf32>
    %10 = vector.broadcast %8 : vector<1x256xf32> to vector<8x256xf32>
    %11 = arith.mulf %10, %9 : vector<8x256xf32>
    %12 = arith.addf %7, %11 : vector<8x256xf32>
    %13 = vector.extract_strided_slice %3 {offsets = [2, 0], sizes = [1, 256], strides = [1, 1]} : vector<3x256xf32> to vector<1x256xf32>
    %14 = vector.extract_strided_slice %2 {offsets = [16, 0], sizes = [8, 256], strides = [1, 1]} : vector<24x256xf32> to vector<8x256xf32>
    %15 = vector.broadcast %13 : vector<1x256xf32> to vector<8x256xf32>
    %16 = arith.mulf %15, %14 : vector<8x256xf32>
    %17 = arith.addf %12, %16 : vector<8x256xf32>
    %c0_5 = arith.constant 0 : index
    %c0_6 = arith.constant 0 : index
    %18 = vector.load %arg4[%c0_5, %c0_6] : memref<8x256xf32, #tpu.memory_space<vmem>>, vector<8x256xf32>
    tpu.vector_store %arg4[%c0_5, %c0_6], %17 {strides = array<i32>} : memref<8x256xf32, #tpu.memory_space<vmem>>, vector<8x256xf32>,
    return
  }
  func.func @transform_0(%arg0: i32) -> (i32, i32) {
    %c0_i32 = arith.constant 0 : i32
    %c0_i32_0 = arith.constant 0 : i32
    return %c0_i32, %arg0 : i32, i32
  }
  func.func @transform_1(%arg0: i32) -> (i32, i32) {
    %c0_i32 = arith.constant 0 : i32
    %c0_i32_0 = arith.constant 0 : i32
    %c0_i32_1 = arith.constant 0 : i32
    return %c0_i32, %c0_i32_0 : i32, i32
  }
  func.func @transform_2(%arg0: i32) -> (i32, i32) {
    %c0_i32 = arith.constant 0 : i32
    %c0_i32_0 = arith.constant 0 : i32
    return %c0_i32, %arg0 : i32, i32
  }
  func.func @transform_3(%arg0: i32) -> (i32, i32) {
    %c0_i32 = arith.constant 0 : i32
    %c0_i32_0 = arith.constant 0 : i32
    return %c0_i32, %arg0 : i32, i32
  }
}

</mosaic_0001>

<bundles_post_ra>
// kernel: conv_basis2d.1
= control target key start
LH: loop header
LB: loop body
LE: loop exit
PB: predicated region body
PF: predicated region fallthrough
CT: control target
= control target key end

     0   :  { %s589_s12 = smov 0   ;;  %s591_s13 = smov 0   ;;  %s657_s0 = inlined_call_operand.vmem [shape: f32[36,512], index: 0, kind: input, shape index: {}]   ;;  %s658_s1 = inlined_call_operand.vmem [shape: f32[24,36], index: 1, kind: input, shape index: {}]   ;;  %s659_s2 = inlined_call_operand.vmem [shape: f32[3,512], index: 2, kind: input, shape index: {}]   ;;  %s660_s3 = inlined_call_operand.vmem [shape: f32[8,512], index: 3, kind: output, shape index: {}]  }
   0x1   :  { %s593_s14 = smov 0  }
   0x2 LB: > { %s488_s15 = sadd.s32 4294967295, %s566_s14   ;;  %s606_s16 = sadd.s32 1, %s566_s14   ;;  %s566_s14 = sphi %s593_s14, %s663_s14   ;;  %s562_s13 = sphi %s591_s13, %s662_s13   ;;  %s558_s12 = sphi %s589_s12, %s661_s12  }
   0x3   : > { %s17_s17 = ssub.s32 %s566_s14, %s606_s16  ;;  %s20_s18 = sadd.s32 1, %s562_s13 }
   0x4   : > { %p18_p0 = scmp.eq.s32.totalorder %s17_s17, 0  ;;  %p27_p1 = scmp.ne.s32.totalorder %s562_s13, %s558_s12 }
   0x5   : > { %p28_p2 = scmp.eq.s32.totalorder %s566_s14, 0  ;;  %p491_p4 = scmp.ge.s32.totalorder %s566_s14, 2 }
   0x6   : > { %s615_s19 = scalar_select %p18_p0, %s562_s13, %s20_s18  }
   0x7   : > { %p29_p3 = por %p28_p2, %p27_p1  ;;  %129 = sbr.rel (%p491_p4) target bundleno = 21 (0x15), region = 20 }
   0xc   : > { %132 = sbr.rel (!%p29_p3) target bundleno = 21 (0x15), region = 24  ;;  %s134_s20 = sand.u32 (%p29_p3), 1, %s562_s13  }
   0xd   : > { %s506_s21 = sshll.u32 (%p29_p3), %s566_s14, 4  ;;  %s517_s22 = smul.u32 (%p29_p3), 80, %s134_s20 }
   0xe   : > { %s139_s25 = scalar_lea.vmem (%p29_p3), %s657_s0, %s506_s21 }
   0xf   : > { %v152_v0 = vld [vmem:[%s139_s25] sm:$0xff] (%p29_p3)  ;;  %v154_v1 = vld [vmem:[%s139_s25 + $0x8] sm:$0xff] (%p29_p3)  ;;  %s136_s26 = scalar_lea.vmem (%p29_p3), [#allocation2], %s517_s22 }
  0x10   : > { %v156_v2 = vld [vmem:[%s139_s25 + $0x20] sm:$0xff] (%p29_p3)  ;;  %v158_v3 = vld [vmem:[%s139_s25 + $0x28] sm:$0xff] (%p29_p3)  ;;  %153 = vst [vmem:[%s136_s26] sm:$0xff] (%p29_p3), %v152_v0  ;;  %155 = vst [vmem:[%s136_s26 + $0x8] sm:$0xff] (%p29_p3), %v154_v1 }
  0x11   : > { %v160_v4 = vld [vmem:[%s139_s25 + $0x40] sm:$0xff]  ;;  %v162_v5 = vld [vmem:[%s139_s25 + $0x48] sm:$0xff]  ;;  %157 = vst [vmem:[%s136_s26 + $0x10] sm:$0xff] %v156_v2  ;;  %159 = vst [vmem:[%s136_s26 + $0x18] sm:$0xff] %v158_v3 }
  0x12   : > { %161 = vst [vmem:[%s136_s26 + $0x20] sm:$0xff] %v160_v4  ;;  %163 = vst [vmem:[%s136_s26 + $0x28] sm:$0xff] %v162_v5  ;;  %v164_v6 = vld [vmem:[%s139_s25 + $0x60] sm:$0xff]  ;;  %v166_v7 = vld [vmem:[%s139_s25 + $0x68] sm:$0xff] }
  0x13   : > { %v168_v8 = vld [vmem:[%s139_s25 + $0x80] sm:$0xff]  ;;  %165 = vst [vmem:[%s136_s26 + $0x30] sm:$0xff] %v164_v6  ;;  %167 = vst [vmem:[%s136_s26 + $0x38] sm:$0xff] %v166_v7  ;;  %v170_v9 = vld [vmem:[%s139_s25 + $0x88] sm:$0xff] }
  0x14   : > { %169 = vst [vmem:[%s136_s26 + $0x40] sm:$0xff] %v168_v8  ;;  %171 = vst [vmem:[%s136_s26 + $0x48] sm:$0xff] %v170_v9 }
  0x15 PF: > { %p494_p5 = scmp.ge.s32.totalorder %s566_s14, 1  ;;  %p185_p6 = scmp.lt.s32.totalorder %s566_s14, 3 }
  0x17   : > { %p186_p7 = pnand %p494_p5, %p185_p6 }
  0x18   : > { %s192_s27 = sand.u32 (!%p186_p7), 1, %s558_s12   ;;  %s495_s9 = sshll.u32 (!%p186_p7), %s488_s15, 1 }
  0x19   : > { %189 = sbr.rel (%p186_p7) target bundleno = 246 (0xf6), region = 51  ;;  %p222_p8 = scmp.lt.s32.totalorder (!%p186_p7), %s495_s9, 3 }
  0x1a   : > { %s518_s28 = smul.u32 (!%p186_p7), 80, %s192_s27 }
  0x1c   : > { %s194_s29 = scalar_lea.vmem (!%p186_p7), [#allocation2], %s518_s28 }
  0x1e   : > { %v568_v10 = vmov 0.0   ;;  %vm256_vm0 = vcmask 1043456   ;;  %v245_v11 = vld [vmem:[%s194_s29 + $0x48] sm:$0xf]  ;;  %v244_v12 = vld [vmem:[%s194_s29 + $0x40] sm:$0xf]  ;;  %v348_v24 = vlaneseq }
  0x1f   : > { %327 = vmatprep.mubr.f32.mxu0 %v568_v10  ;;  %333 = vmatprep.mubr.f32.mxu1 %v568_v10  ;;  %v243_v13 = vld [vmem:[%s194_s29 + $0x38] sm:$0xff]  ;;  %v242_v14 = vld [vmem:[%s194_s29 + $0x30] sm:$0xff]  ;;  %v241_v15 = vld [vmem:[%s194_s29 + $0x28] sm:$0xff]  ;;  %vm246_vm1 = vcmask 293888   ;;  %s665_s9 = smov (!%p222_p8, %s495_s9), 3 }
  0x20   : > { %499 = vmatprep.subr.msk.mxu0 %vm256_vm0, %v245_v11  ;;  %507 = vmatprep.subr.msk.mxu1 %vm256_vm0, %v245_v11  ;;  %v240_v16 = vld [vmem:[%s194_s29 + $0x20] sm:$0xff]  ;;  %v239_v17 = vld [vmem:[%s194_s29 + $0x18] sm:$0xff]  ;;  %v238_v18 = vld [vmem:[%s194_s29 + $0x10] sm:$0xff]  ;;  %s496_s10 = sshll.u32 %s665_s9, 2  ;;  %v349_v25 = vshrl.u32 %v348_v24, 7  ;;  %s498_s14 = sshll.u32 %s665_s9, 3 }
  0x21   : > { %500 = vmatpush1.msk.msra.mxu0 %vm256_vm0, %v244_v12  ;;  %512 = vmatpush1.msk.msra.mxu1 %vm256_vm0, %v244_v12  ;;  %v237_v19 = vld [vmem:[%s194_s29 + $0x8] sm:$0xff]  ;;  %v236_v20 = vld [vmem:[%s194_s29] sm:$0xff]  ;;  %s225_s17 = scalar_lea.vmem %s659_s2, %s496_s10  ;;  %s231_s20 = scalar_lea.vmem %s660_s3, %s498_s14 }
  0x22   : > { %287 = vmatprep.subr.mxu0 %v243_v13  ;;  %508 = vmatprep.subr.mxu1 %v243_v13  ;;  %v233_v21 = vld [vmem:[%s658_s1] sm:$0xff]  ;;  %v234_v22 = vld [vmem:[%s658_s1 + $0x8] sm:$0xff]  ;;  %v235_v23 = vld [vmem:[%s658_s1 + $0x10] sm:$0xff]  ;;  %v350_v26 = vsub.s32 0, %v349_v25  ;;  %v370_v27 = vsub.s32 1, %v349_v25  ;;  %v354_v29 = vsub.s32 4, %v349_v25 }
  0x23   : > { %288 = vmatpush1.msra.mxu0 %v242_v14  ;;  %513 = vmatpush1.msra.mxu1 %v242_v14  ;;  %v346_v28 = vld [vmem:[%s225_s17] sm:$0x77]  ;;  %v374_v30 = vsub.s32 5, %v349_v25  ;;  %v392_v33 = vsub.s32 2, %v349_v25  ;;  %v396_v36 = vsub.s32 6, %v349_v25 }
  0x24   : > { %289 = vmatprep.subr.mxu0 %v241_v15  ;;  %509 = vmatprep.subr.mxu1 %v241_v15  ;;  %v351_v31 = vrot.slane %v346_v28, %v350_v26  ;;  %v371_v32 = vrot.slane %v346_v28, %v370_v27  ;;  %v355_v34 = vrot.slane %v346_v28, %v354_v29 }
  0x25   : > { %290 = vmatpush1.msra.mxu0 %v240_v16  ;;  %514 = vmatpush1.msra.mxu1 %v240_v16  ;;  %v375_v35 = vrot.slane %v346_v28, %v374_v30  ;;  %v393_v39 = vrot.slane %v346_v28, %v392_v33  ;;  %v397_v42 = vrot.slane %v346_v28, %v396_v36 }
  0x26   : > { %291 = vmatprep.subr.mxu0 %v239_v17  ;;  %510 = vmatprep.subr.mxu1 %v239_v17  ;;  %v361_v37 = vrot.slane %v351_v31, %v350_v26  ;;  %v381_v38 = vrot.slane %v371_v32, %v370_v27  ;;  %v365_v40 = vrot.slane %v355_v34, %v350_v26 }
  0x27   : > { %292 = vmatpush1.msra.mxu0 %v238_v18  ;;  %515 = vmatpush1.msra.mxu1 %v238_v18  ;;  %v385_v41 = vrot.slane %v375_v35, %v370_v27  ;;  %v403_v47 = vrot.slane %v393_v39, %v392_v33  ;;  %v407_v52 = vrot.slane %v397_v42, %v392_v33 }
  0x28   : > { %293 = vmatprep.subr.mxu0 %v237_v19  ;;  %511 = vmatprep.subr.mxu1 %v237_v19 }
  0x29   : > { %294 = vmatpush1.msra.mxu0 %v236_v20  ;;  %516 = vmatpush1.msra.mxu1 %v236_v20 }
  0x2a   : > { %501 = vmatmul.mubr.msk.f32.vlgmr.msra.gmra.mxu0 %vm246_vm1, %v233_v21  ;;  %502 = vmatmul.mubr.msk.f32.vlgmr.msra.gmra.mxu1 %vm246_vm1, %v234_v22 }
  0x2b   : > { %339 = vmatprep.mubr.f32.mxu1 %v568_v10 }
  0x2e   : > { %503 = vmatmul.mubr.msk.f32.gmra.mxu1 %vm246_vm1, %v235_v23 }
  0xea   : > { %v329_v43 = vpop.f32.mrf.mxu0  ;;  %v335_v44 = vpop.f32.mrf.mxu1 }
  0xeb   : > { %v366_v45 = vmul.f32 %v361_v37, %v329_v43  ;;  %v386_v46 = vmul.f32 %v381_v38, %v335_v44 }
  0xec   : > { %v331_v48 = vpop.f32.mrf.mxu0  ;;  %v337_v49 = vpop.f32.mrf.mxu1 }
  0xed   : > { %v367_v50 = vmul.f32 %v365_v40, %v331_v48  ;;  %v387_v51 = vmul.f32 %v385_v41, %v337_v49  ;;  %v388_v54 = vadd.f32 %v386_v46, %v366_v45 }
  0xee   : > { %v341_v53 = vpop.f32.mrf.mxu1 }
  0xef   : > { %v408_v55 = vmul.f32 %v403_v47, %v341_v53  ;;  %v389_v57 = vadd.f32 %v387_v51, %v367_v50 }
  0xf0   : > { %v343_v56 = vpop.f32.mrf.mxu1 }
  0xf1   : > { %v410_v58 = vadd.f32 %v408_v55, %v388_v54  ;;  %v409_v59 = vmul.f32 %v407_v52, %v343_v56 }
  0xf3   : > { %412 = vst [vmem:[%s231_s20] sm:$0xff] %v410_v58  ;;  %v411_v60 = vadd.f32 %v409_v59, %v389_v57 }
  0xf5   : > { %413 = vst [vmem:[%s231_s20 + $0x8] sm:$0xff] %v411_v60 }
  0xf6 PF: > { %p10_p9 = scmp.ge.s32.totalorder %s606_s16, 4   ;;  %s661_s12 = smov %s562_s13 }
  0xf7   : > { %s662_s13 = smov %s615_s19  ;;  %s663_s14 = smov %s606_s16 }
  0xf8   :  { %12 = sbr.rel (!%p10_p9) target bundleno = 2 (0x2), region = 93 }

</bundles_post_ra>
